<compile_context>
chip_gen: v7x
topology: tpu7x:2x2x1
jax: 0.10.0
libtpu: 0.0.40
codegen_flags: <defaults>
</compile_context>

<pallas_src>
import functools

import jax
import jax.numpy as jnp
from jax.experimental import pallas as pl
from jax.experimental.pallas import tpu as pltpu


def _round_up(x, m):
    return ((x + m - 1) // m) * m


def _lrelu(v):
    # nn.LeakyReLU() default negative_slope = 0.01 (f32, VPU)
    return jnp.where(v > 0, v, 0.01 * v)


def vae_kernel(x_ref, eps_ref,
               w1_ref, b1_ref, w2_ref, b2_ref,
               wuz_ref, buz_ref,
               w3_ref, b3_ref, w4_ref, b4_ref, w5_ref, b5_ref,
               out_ref, *, input_dim, z_dim, out_w, pad_w):
    mm_dtype = w1_ref.dtype      # bf16 on the fast path (f32 if use_bf16=False)
    x = x_ref[...]               # already cast to mm_dtype in the wrapper
    eps = eps_ref[...].astype(jnp.float32)

    # Encoder: MXU matmuls accumulate in f32; element-wise stays f32
    # (v5e VPU/EUP have no bf16 path — keep lrelu/exp/bias-add in f32).
    h = _lrelu(jnp.dot(x, w1_ref[...],
                       preferred_element_type=jnp.float32) + b1_ref[...])
    h = _lrelu(jnp.dot(h.astype(mm_dtype), w2_ref[...],
                       preferred_element_type=jnp.float32) + b2_ref[...])

    # Fused latent heads: one (64, 2*z_dim) matmul instead of two (64, z_dim).
    uls = jnp.dot(h.astype(mm_dtype), wuz_ref[...],
                  preferred_element_type=jnp.float32) + buz_ref[...]
    u = uls[:, :z_dim]
    ls = uls[:, z_dim:]

    # Reparameterization: z = u + exp(log_sigma2 / 2) * eps   (exp -> EUP slot)
    z = u + jnp.exp(ls * 0.5) * eps

    # Decoder
    d = _lrelu(jnp.dot(z.astype(mm_dtype), w3_ref[...],
                       preferred_element_type=jnp.float32) + b3_ref[...])
    d = _lrelu(jnp.dot(d.astype(mm_dtype), w4_ref[...],
                       preferred_element_type=jnp.float32) + b4_ref[...])
    recon = jnp.dot(d.astype(mm_dtype), w5_ref[...],
                    preferred_element_type=jnp.float32) + b5_ref[...]

    # Direct static lane-slice stores into the packed lane-dense output slab
    # [recon | z | u | log_sigma2 | zero pad] — no full-width concat temp.
    odt = out_ref.dtype
    out_ref[:, :input_dim] = recon.astype(odt)
    out_ref[:, input_dim:input_dim + z_dim] = z.astype(odt)
    out_ref[:, input_dim + z_dim:input_dim + 2 * z_dim] = u.astype(odt)
    out_ref[:, input_dim + 2 * z_dim:out_w] = ls.astype(odt)
    if pad_w > 0:
        out_ref[:, out_w:] = jnp.zeros((out_ref.shape[0], pad_w), odt)


def init_params(key, input_dim, z_dim):
    """Deterministic init mimicking torch.nn.Linear default U(-1/sqrt(fan_in), +)."""
    dims = [
        ("lr", input_dim, 128),
        ("lr2", 128, 64),
        ("lr_ave", 64, z_dim),
        ("lr_dev", 64, z_dim),
        ("lr3", z_dim, 64),
        ("lr4", 64, 128),
        ("lr5", 128, input_dim),
    ]
    params = {}
    for name, fan_in, fan_out in dims:
        key, kw, kb = jax.random.split(key, 3)
        bound = 1.0 / jnp.sqrt(jnp.float32(fan_in))
        # Stored as (in, out) so the kernel does x @ W directly
        # (equivalent to torch's x @ W_torch.T with W_torch of shape (out, in)).
        params[name + "_w"] = jax.random.uniform(
            kw, (fan_in, fan_out), jnp.float32, -bound, bound)
        params[name + "_b"] = jax.random.uniform(
            kb, (1, fan_out), jnp.float32, -bound, bound)
    return params


def _choose_batch_tile(B, batch_tile):
    """Large tiles (amortize ~0.35us/step overhead), but keep >=2 grid steps
    when the batch allows it so v7x's two TensorCores both get work."""
    target = min(batch_tile, B)
    if B > 8 and _round_up(target, 8) >= _round_up(B, 8):
        target = (B + 1) // 2
    return max(8, _round_up(target, 8))


def deep_vae_forward(x, eps, params, *, batch_tile=1024, use_bf16=True,
                     out_dtype=None):
    """Returns (recon, z, u, log_sigma2), matching VAE.forward (eps passed in)."""
    B, input_dim = x.shape
    z_dim = params["lr_ave_w"].shape[1]
    mm_dtype = jnp.bfloat16 if use_bf16 else jnp.float32
    if out_dtype is None:
        # bf16 packed slab halves the dominant HBM write stream on the fast path.
        out_dtype = jnp.bfloat16 if use_bf16 else jnp.float32
    mm_itemsize = jnp.dtype(mm_dtype).itemsize
    out_itemsize = jnp.dtype(out_dtype).itemsize

    # Fuse the two latent-head linears into a single matmul.
    wuz = jnp.concatenate([params["lr_ave_w"], params["lr_dev_w"]], axis=1)
    buz = jnp.concatenate([params["lr_ave_b"], params["lr_dev_b"]], axis=1)

    weights = [params["lr_w"], params["lr2_w"], wuz,
               params["lr3_w"], params["lr4_w"], params["lr5_w"]]
    biases = [params["lr_b"], params["lr2_b"], buz,
              params["lr3_b"], params["lr4_b"], params["lr5_b"]]
    weights = [w.astype(mm_dtype) for w in weights]          # MXU operands
    biases = [b.astype(jnp.float32) for b in biases]         # f32 adds

    tb = _choose_batch_tile(B, batch_tile)
    b_pad = _round_up(B, tb)
    if b_pad != B:
        x = jnp.pad(x, ((0, b_pad - B), (0, 0)))
        eps = jnp.pad(eps, ((0, b_pad - B), (0, 0)))
    num_tiles = b_pad // tb

    x = x.astype(mm_dtype)
    eps = eps.astype(mm_dtype)   # bf16 eps halves its DMA; upcast in-kernel

    # Packed, lane-dense output slab: [recon | z | u | log_sigma2 | pad]
    out_w = input_dim + 3 * z_dim
    out_w_pad = _round_up(out_w, 128)
    pad_w = out_w_pad - out_w

    def batch_spec(feat):
        return pl.BlockSpec((tb, feat), lambda i: (i, 0))

    def const_spec(shape):
        # Constant block index -> DMA'd once, stays VMEM-resident across grid.
        # (pl.Buffered(1) would drop the redundant second weight buffer; skipped
        #  — negligible at these weight sizes, keeps compile risk at zero.)
        return pl.BlockSpec(shape, lambda i: (0, 0))

    in_specs = [batch_spec(input_dim), batch_spec(z_dim)]
    args = [x, eps]
    for w, b in zip(weights, biases):
        in_specs += [const_spec(w.shape), const_spec(b.shape)]
        args += [w, b]

    weight_bytes = sum(a.size * a.dtype.itemsize for a in weights + biases)

    # Explicit VMEM limit from the actual double-buffered footprint (+30%),
    # floored at the 32 MiB default and capped well under physical VMEM.
    io_per_step = (tb * (input_dim + z_dim) * mm_itemsize
                   + tb * out_w_pad * out_itemsize)
    inter_bytes = tb * (input_dim + 2 * 128 + 2 * 64 + 4 * z_dim + out_w_pad) * 4
    vmem_need = 2 * io_per_step + 2 * weight_bytes + inter_bytes
    vmem_limit = int(min(max(1.3 * vmem_need, 32 * 1024 * 1024),
                         100 * 1024 * 1024))

    flops_per_row = 2 * (input_dim * 128 + 128 * 64 + 64 * 2 * z_dim
                         + z_dim * 64 + 64 * 128 + 128 * input_dim)
    cost = pl.CostEstimate(
        flops=flops_per_row * b_pad,
        transcendentals=b_pad * z_dim,
        bytes_accessed=(x.size * x.dtype.itemsize
                        + eps.size * eps.dtype.itemsize
                        + b_pad * out_w_pad * out_itemsize
                        + weight_bytes),
    )

    packed = pl.pallas_call(
        functools.partial(vae_kernel, input_dim=input_dim, z_dim=z_dim,
                          out_w=out_w, pad_w=pad_w),
        grid=(num_tiles,),
        in_specs=in_specs,
        out_specs=pl.BlockSpec((tb, out_w_pad), lambda i: (i, 0)),
        out_shape=jax.ShapeDtypeStruct((b_pad, out_w_pad), out_dtype),
        compiler_params=pltpu.CompilerParams(
            dimension_semantics=("parallel",),
            vmem_limit_bytes=vmem_limit),
        cost_estimate=cost,
    )(*args)

    recon = packed[:B, :input_dim]
    z = packed[:B, input_dim:input_dim + z_dim]
    u = packed[:B, input_dim + z_dim:input_dim + 2 * z_dim]
    ls = packed[:B, input_dim + 2 * z_dim:input_dim + 3 * z_dim]
    return recon, z, u, ls


def vae_forward_ref(x, eps, params, *, use_bf16=True):
    """Pure-JAX reference with the same matmul-operand dtype as the kernel."""
    mm_dtype = jnp.bfloat16 if use_bf16 else jnp.float32

    def lin(a, w, b):
        return jnp.dot(a.astype(mm_dtype), w.astype(mm_dtype),
                       preferred_element_type=jnp.float32) + b

    def lrelu(v):
        return jnp.where(v > 0, v, 0.01 * v)

    h = lrelu(lin(x, params["lr_w"], params["lr_b"]))
    h = lrelu(lin(h, params["lr2_w"], params["lr2_b"]))
    u = lin(h, params["lr_ave_w"], params["lr_ave_b"])
    ls = lin(h, params["lr_dev_w"], params["lr_dev_b"])
    z = u + jnp.exp(ls * 0.5) * eps
    d = lrelu(lin(z, params["lr3_w"], params["lr3_b"]))
    d = lrelu(lin(d, params["lr4_w"], params["lr4_b"]))
    recon = lin(d, params["lr5_w"], params["lr5_b"])
    return recon, z, u, ls


if __name__ == "__main__":
    B = 8
    INPUT_DIM = 32
    Z_DIM = 16

    key = jax.random.PRNGKey(0)
    k_params, k_x, k_eps = jax.random.split(key, 3)

    params = init_params(k_params, INPUT_DIM, Z_DIM)
    x = jax.random.normal(k_x, (B, INPUT_DIM), jnp.float32)
    # torch.randn_like(u) — noise generated outside the kernel, passed in.
    eps = jax.random.normal(k_eps, (B, Z_DIM), jnp.float32)

    # Fast path: bf16 MXU operands, bf16 packed output slab.
    recon, z, u, log_sigma2 = deep_vae_forward(x, eps, params, use_bf16=True)
    jax.block_until_ready((recon, z, u, log_sigma2))

    r_ref, z_ref, u_ref, ls_ref = vae_forward_ref(x, eps, params, use_bf16=True)
    assert jnp.allclose(recon.astype(jnp.float32), r_ref, atol=2e-2, rtol=2e-2)
    assert jnp.allclose(z.astype(jnp.float32), z_ref, atol=2e-2, rtol=2e-2)
    assert jnp.allclose(u.astype(jnp.float32), u_ref, atol=2e-2, rtol=2e-2)
    assert jnp.allclose(log_sigma2.astype(jnp.float32), ls_ref,
                        atol=2e-2, rtol=2e-2)

    # f32-path validation (use_bf16=False): all-f32 matmuls, f32 output slab.
    # Tolerance kept modest since Mosaic and XLA may pick different f32 matmul
    # pass counts; the bf16 check above is the tight apples-to-apples one.
    recon32, z32, u32, ls32 = deep_vae_forward(x, eps, params, use_bf16=False)
    jax.block_until_ready((recon32, z32, u32, ls32))
    r32, zz32, uu32, l32 = vae_forward_ref(x, eps, params, use_bf16=False)
    assert jnp.allclose(recon32, r32, atol=2e-2, rtol=2e-2)
    assert jnp.allclose(z32, zz32, atol=2e-2, rtol=2e-2)
    assert jnp.allclose(u32, uu32, atol=2e-2, rtol=2e-2)
    assert jnp.allclose(ls32, l32, atol=2e-2, rtol=2e-2)

    print("KERNEL_OK")
</pallas_src>

<mosaic_0001>
module attributes {stable_mosaic.version = 11 : i64} {
  func.func @vae_kernel(%arg0: i32, %arg1: memref<8x32xbf16, #tpu.memory_space<vmem>>, %arg2: memref<8x16xbf16, #tpu.memory_space<vmem>>, %arg3: memref<32x128xbf16, #tpu.memory_space<vmem>>, %arg4: memref<1x128xf32, #tpu.memory_space<vmem>>, %arg5: memref<128x64xbf16, #tpu.memory_space<vmem>>, %arg6: memref<1x64xf32, #tpu.memory_space<vmem>>, %arg7: memref<64x32xbf16, #tpu.memory_space<vmem>>, %arg8: memref<1x32xf32, #tpu.memory_space<vmem>>, %arg9: memref<16x64xbf16, #tpu.memory_space<vmem>>, %arg10: memref<1x64xf32, #tpu.memory_space<vmem>>, %arg11: memref<64x128xbf16, #tpu.memory_space<vmem>>, %arg12: memref<1x128xf32, #tpu.memory_space<vmem>>, %arg13: memref<128x32xbf16, #tpu.memory_space<vmem>>, %arg14: memref<1x32xf32, #tpu.memory_space<vmem>>, %arg15: memref<8x128xbf16, #tpu.memory_space<vmem>>) attributes {dimension_semantics = [#tpu.dimension_semantics<parallel>], iteration_bounds = array<i64: 1>, scalar_prefetch = 0 : i64, scratch_operands = 0 : i64, tpu.core_type = #tpu.core_type<tc>, window_params = [{transform_indices = @transform_0, window_bounds = array<i64: 8, 32>}, {transform_indices = @transform_1, window_bounds = array<i64: 8, 16>}, {pipeline_mode = #tpu.pipeline_mode<synchronous>, transform_indices = @transform_2, window_bounds = array<i64: 32, 128>}, {pipeline_mode = #tpu.pipeline_mode<synchronous>, transform_indices = @transform_3, window_bounds = array<i64: 1, 128>}, {pipeline_mode = #tpu.pipeline_mode<synchronous>, transform_indices = @transform_4, window_bounds = array<i64: 128, 64>}, {pipeline_mode = #tpu.pipeline_mode<synchronous>, transform_indices = @transform_5, window_bounds = array<i64: 1, 64>}, {pipeline_mode = #tpu.pipeline_mode<synchronous>, transform_indices = @transform_6, window_bounds = array<i64: 64, 32>}, {pipeline_mode = #tpu.pipeline_mode<synchronous>, transform_indices = @transform_7, window_bounds = array<i64: 1, 32>}, {pipeline_mode = #tpu.pipeline_mode<synchronous>, transform_indices = @transform_8, window_bounds = array<i64: 16, 64>}, {pipeline_mode = #tpu.pipeline_mode<synchronous>, transform_indices = @transform_9, window_bounds = array<i64: 1, 64>}, {pipeline_mode = #tpu.pipeline_mode<synchronous>, transform_indices = @transform_10, window_bounds = array<i64: 64, 128>}, {pipeline_mode = #tpu.pipeline_mode<synchronous>, transform_indices = @transform_11, window_bounds = array<i64: 1, 128>}, {pipeline_mode = #tpu.pipeline_mode<synchronous>, transform_indices = @transform_12, window_bounds = array<i64: 128, 32>}, {pipeline_mode = #tpu.pipeline_mode<synchronous>, transform_indices = @transform_13, window_bounds = array<i64: 1, 32>}, {transform_indices = @transform_14, window_bounds = array<i64: 8, 128>}]} {
    %c0 = arith.constant 0 : index
    %c0_0 = arith.constant 0 : index
    %0 = vector.load %arg1[%c0, %c0_0] : memref<8x32xbf16, #tpu.memory_space<vmem>>, vector<8x32xbf16>
    %c0_1 = arith.constant 0 : index
    %c0_2 = arith.constant 0 : index
    %1 = vector.load %arg2[%c0_1, %c0_2] : memref<8x16xbf16, #tpu.memory_space<vmem>>, vector<8x16xbf16>
    %2 = arith.extf %1 : vector<8x16xbf16> to vector<8x16xf32>
    %c0_3 = arith.constant 0 : index
    %c0_4 = arith.constant 0 : index
    %3 = vector.load %arg3[%c0_3, %c0_4] : memref<32x128xbf16, #tpu.memory_space<vmem>>, vector<32x128xbf16>
    %cst = arith.constant dense<0.000000e+00> : vector<8x128xf32>
    %4 = tpu.matmul %0, %3, %cst {dimension_numbers = #tpu.dot_dimension_numbers<[1], [0], [0], [1], [0, 0, 1, 1], [], []>} : vector<8x32xbf16>, vector<32x128xbf16>, vector<8x128xf32> -> vector<8x128xf32>
    %c0_5 = arith.constant 0 : index
    %c0_6 = arith.constant 0 : index
    %5 = vector.load %arg4[%c0_5, %c0_6] : memref<1x128xf32, #tpu.memory_space<vmem>>, vector<1x128xf32>
    %6 = vector.broadcast %5 : vector<1x128xf32> to vector<8x128xf32>
    %7 = arith.addf %4, %6 : vector<8x128xf32>
    %cst_7 = arith.constant 0.000000e+00 : f32
    %8 = vector.broadcast %cst_7 : f32 to vector<8x128xf32>
    %9 = arith.cmpf ogt, %7, %8 : vector<8x128xf32>
    %cst_8 = arith.constant 0.00999999977 : f32
    %10 = vector.broadcast %cst_8 : f32 to vector<8x128xf32>
    %11 = arith.mulf %10, %7 : vector<8x128xf32>
    %12 = arith.select %9, %7, %11 : vector<8x128xi1>, vector<8x128xf32>
    %13 = arith.truncf %12 : vector<8x128xf32> to vector<8x128xbf16>
    %c0_9 = arith.constant 0 : index
    %c0_10 = arith.constant 0 : index
    %14 = vector.load %arg5[%c0_9, %c0_10] : memref<128x64xbf16, #tpu.memory_space<vmem>>, vector<128x64xbf16>
    %cst_11 = arith.constant dense<0.000000e+00> : vector<8x64xf32>
    %15 = tpu.matmul %13, %14, %cst_11 {dimension_numbers = #tpu.dot_dimension_numbers<[1], [0], [0], [1], [0, 0, 1, 1], [], []>} : vector<8x128xbf16>, vector<128x64xbf16>, vector<8x64xf32> -> vector<8x64xf32>
    %c0_12 = arith.constant 0 : index
    %c0_13 = arith.constant 0 : index
    %16 = vector.load %arg6[%c0_12, %c0_13] : memref<1x64xf32, #tpu.memory_space<vmem>>, vector<1x64xf32>
    %17 = vector.broadcast %16 : vector<1x64xf32> to vector<8x64xf32>
    %18 = arith.addf %15, %17 : vector<8x64xf32>
    %cst_14 = arith.constant 0.000000e+00 : f32
    %19 = vector.broadcast %cst_14 : f32 to vector<8x64xf32>
    %20 = arith.cmpf ogt, %18, %19 : vector<8x64xf32>
    %cst_15 = arith.constant 0.00999999977 : f32
    %21 = vector.broadcast %cst_15 : f32 to vector<8x64xf32>
    %22 = arith.mulf %21, %18 : vector<8x64xf32>
    %23 = arith.select %20, %18, %22 : vector<8x64xi1>, vector<8x64xf32>
    %24 = arith.truncf %23 : vector<8x64xf32> to vector<8x64xbf16>
    %c0_16 = arith.constant 0 : index
    %c0_17 = arith.constant 0 : index
    %25 = vector.load %arg7[%c0_16, %c0_17] : memref<64x32xbf16, #tpu.memory_space<vmem>>, vector<64x32xbf16>
    %cst_18 = arith.constant dense<0.000000e+00> : vector<8x32xf32>
    %26 = tpu.matmul %24, %25, %cst_18 {dimension_numbers = #tpu.dot_dimension_numbers<[1], [0], [0], [1], [0, 0, 1, 1], [], []>} : vector<8x64xbf16>, vector<64x32xbf16>, vector<8x32xf32> -> vector<8x32xf32>
    %c0_19 = arith.constant 0 : index
    %c0_20 = arith.constant 0 : index
    %27 = vector.load %arg8[%c0_19, %c0_20] : memref<1x32xf32, #tpu.memory_space<vmem>>, vector<1x32xf32>
    %28 = vector.broadcast %27 : vector<1x32xf32> to vector<8x32xf32>
    %29 = arith.addf %26, %28 : vector<8x32xf32>
    %30 = vector.extract_strided_slice %29 {offsets = [0, 0], sizes = [8, 16], strides = [1, 1]} : vector<8x32xf32> to vector<8x16xf32>
    %31 = vector.extract_strided_slice %29 {offsets = [0, 16], sizes = [8, 16], strides = [1, 1]} : vector<8x32xf32> to vector<8x16xf32>
    %cst_21 = arith.constant 5.000000e-01 : f32
    %32 = vector.broadcast %cst_21 : f32 to vector<8x16xf32>
    %33 = arith.mulf %31, %32 : vector<8x16xf32>
    %34 = math.exp %33 : vector<8x16xf32>
    %35 = arith.mulf %34, %2 : vector<8x16xf32>
    %36 = arith.addf %30, %35 : vector<8x16xf32>
    %37 = arith.truncf %36 : vector<8x16xf32> to vector<8x16xbf16>
    %c0_22 = arith.constant 0 : index
    %c0_23 = arith.constant 0 : index
    %38 = vector.load %arg9[%c0_22, %c0_23] : memref<16x64xbf16, #tpu.memory_space<vmem>>, vector<16x64xbf16>
    %cst_24 = arith.constant dense<0.000000e+00> : vector<8x64xf32>
    %39 = tpu.matmul %37, %38, %cst_24 {dimension_numbers = #tpu.dot_dimension_numbers<[1], [0], [0], [1], [0, 0, 1, 1], [], []>} : vector<8x16xbf16>, vector<16x64xbf16>, vector<8x64xf32> -> vector<8x64xf32>
    %c0_25 = arith.constant 0 : index
    %c0_26 = arith.constant 0 : index
    %40 = vector.load %arg10[%c0_25, %c0_26] : memref<1x64xf32, #tpu.memory_space<vmem>>, vector<1x64xf32>
    %41 = vector.broadcast %40 : vector<1x64xf32> to vector<8x64xf32>
    %42 = arith.addf %39, %41 : vector<8x64xf32>
    %cst_27 = arith.constant 0.000000e+00 : f32
    %43 = vector.broadcast %cst_27 : f32 to vector<8x64xf32>
    %44 = arith.cmpf ogt, %42, %43 : vector<8x64xf32>
    %cst_28 = arith.constant 0.00999999977 : f32
    %45 = vector.broadcast %cst_28 : f32 to vector<8x64xf32>
    %46 = arith.mulf %45, %42 : vector<8x64xf32>
    %47 = arith.select %44, %42, %46 : vector<8x64xi1>, vector<8x64xf32>
    %48 = arith.truncf %47 : vector<8x64xf32> to vector<8x64xbf16>
    %c0_29 = arith.constant 0 : index
    %c0_30 = arith.constant 0 : index
    %49 = vector.load %arg11[%c0_29, %c0_30] : memref<64x128xbf16, #tpu.memory_space<vmem>>, vector<64x128xbf16>
    %cst_31 = arith.constant dense<0.000000e+00> : vector<8x128xf32>
    %50 = tpu.matmul %48, %49, %cst_31 {dimension_numbers = #tpu.dot_dimension_numbers<[1], [0], [0], [1], [0, 0, 1, 1], [], []>} : vector<8x64xbf16>, vector<64x128xbf16>, vector<8x128xf32> -> vector<8x128xf32>
    %c0_32 = arith.constant 0 : index
    %c0_33 = arith.constant 0 : index
    %51 = vector.load %arg12[%c0_32, %c0_33] : memref<1x128xf32, #tpu.memory_space<vmem>>, vector<1x128xf32>
    %52 = vector.broadcast %51 : vector<1x128xf32> to vector<8x128xf32>
    %53 = arith.addf %50, %52 : vector<8x128xf32>
    %cst_34 = arith.constant 0.000000e+00 : f32
    %54 = vector.broadcast %cst_34 : f32 to vector<8x128xf32>
    %55 = arith.cmpf ogt, %53, %54 : vector<8x128xf32>
    %cst_35 = arith.constant 0.00999999977 : f32
    %56 = vector.broadcast %cst_35 : f32 to vector<8x128xf32>
    %57 = arith.mulf %56, %53 : vector<8x128xf32>
    %58 = arith.select %55, %53, %57 : vector<8x128xi1>, vector<8x128xf32>
    %59 = arith.truncf %58 : vector<8x128xf32> to vector<8x128xbf16>
    %c0_36 = arith.constant 0 : index
    %c0_37 = arith.constant 0 : index
    %60 = vector.load %arg13[%c0_36, %c0_37] : memref<128x32xbf16, #tpu.memory_space<vmem>>, vector<128x32xbf16>
    %cst_38 = arith.constant dense<0.000000e+00> : vector<8x32xf32>
    %61 = tpu.matmul %59, %60, %cst_38 {dimension_numbers = #tpu.dot_dimension_numbers<[1], [0], [0], [1], [0, 0, 1, 1], [], []>} : vector<8x128xbf16>, vector<128x32xbf16>, vector<8x32xf32> -> vector<8x32xf32>
    %c0_39 = arith.constant 0 : index
    %c0_40 = arith.constant 0 : index
    %62 = vector.load %arg14[%c0_39, %c0_40] : memref<1x32xf32, #tpu.memory_space<vmem>>, vector<1x32xf32>
    %63 = vector.broadcast %62 : vector<1x32xf32> to vector<8x32xf32>
    %64 = arith.addf %61, %63 : vector<8x32xf32>
    %65 = arith.truncf %64 : vector<8x32xf32> to vector<8x32xbf16>
    %c0_41 = arith.constant 0 : index
    %c0_42 = arith.constant 0 : index
    %66 = vector.load %arg15[%c0_41, %c0_42] : memref<8x128xbf16, #tpu.memory_space<vmem>>, vector<8x32xbf16>
    tpu.vector_store %arg15[%c0_41, %c0_42], %65 {strides = array<i32>} : memref<8x128xbf16, #tpu.memory_space<vmem>>, vector<8x32xbf16>,
    %67 = arith.truncf %36 : vector<8x16xf32> to vector<8x16xbf16>
    %c0_43 = arith.constant 0 : index
    %c32 = arith.constant 32 : index
    %68 = vector.load %arg15[%c0_43, %c32] : memref<8x128xbf16, #tpu.memory_space<vmem>>, vector<8x16xbf16>
    tpu.vector_store %arg15[%c0_43, %c32], %67 {strides = array<i32>} : memref<8x128xbf16, #tpu.memory_space<vmem>>, vector<8x16xbf16>,
    %69 = arith.truncf %30 : vector<8x16xf32> to vector<8x16xbf16>
    %c0_44 = arith.constant 0 : index
    %c48 = arith.constant 48 : index
    %70 = vector.load %arg15[%c0_44, %c48] : memref<8x128xbf16, #tpu.memory_space<vmem>>, vector<8x16xbf16>
    tpu.vector_store %arg15[%c0_44, %c48], %69 {strides = array<i32>} : memref<8x128xbf16, #tpu.memory_space<vmem>>, vector<8x16xbf16>,
    %71 = arith.truncf %31 : vector<8x16xf32> to vector<8x16xbf16>
    %c0_45 = arith.constant 0 : index
    %c64 = arith.constant 64 : index
    %72 = vector.load %arg15[%c0_45, %c64] : memref<8x128xbf16, #tpu.memory_space<vmem>>, vector<8x16xbf16>
    tpu.vector_store %arg15[%c0_45, %c64], %71 {strides = array<i32>} : memref<8x128xbf16, #tpu.memory_space<vmem>>, vector<8x16xbf16>,
    %cst_46 = arith.constant 0.000000e+00 : bf16
    %73 = vector.broadcast %cst_46 : bf16 to vector<8x48xbf16>
    %c0_47 = arith.constant 0 : index
    %c80 = arith.constant 80 : index
    %74 = vector.load %arg15[%c0_47, %c80] : memref<8x128xbf16, #tpu.memory_space<vmem>>, vector<8x48xbf16>
    tpu.vector_store %arg15[%c0_47, %c80], %73 {strides = array<i32>} : memref<8x128xbf16, #tpu.memory_space<vmem>>, vector<8x48xbf16>,
    return
  }
  func.func @transform_0(%arg0: i32) -> (i32, i32) {
    %c0_i32 = arith.constant 0 : i32
    %c0_i32_0 = arith.constant 0 : i32
    return %arg0, %c0_i32 : i32, i32
  }
  func.func @transform_1(%arg0: i32) -> (i32, i32) {
    %c0_i32 = arith.constant 0 : i32
    %c0_i32_0 = arith.constant 0 : i32
    return %arg0, %c0_i32 : i32, i32
  }
  func.func @transform_2(%arg0: i32) -> (i32, i32) {
    %c0_i32 = arith.constant 0 : i32
    %c0_i32_0 = arith.constant 0 : i32
    %c0_i32_1 = arith.constant 0 : i32
    return %c0_i32, %c0_i32_0 : i32, i32
  }
  func.func @transform_3(%arg0: i32) -> (i32, i32) {
    %c0_i32 = arith.constant 0 : i32
    %c0_i32_0 = arith.constant 0 : i32
    %c0_i32_1 = arith.constant 0 : i32
    return %c0_i32, %c0_i32_0 : i32, i32
  }
  func.func @transform_4(%arg0: i32) -> (i32, i32) {
    %c0_i32 = arith.constant 0 : i32
    %c0_i32_0 = arith.constant 0 : i32
    %c0_i32_1 = arith.constant 0 : i32
    return %c0_i32, %c0_i32_0 : i32, i32
  }
  func.func @transform_5(%arg0: i32) -> (i32, i32) {
    %c0_i32 = arith.constant 0 : i32
    %c0_i32_0 = arith.constant 0 : i32
    %c0_i32_1 = arith.constant 0 : i32
    return %c0_i32, %c0_i32_0 : i32, i32
  }
  func.func @transform_6(%arg0: i32) -> (i32, i32) {
    %c0_i32 = arith.constant 0 : i32
    %c0_i32_0 = arith.constant 0 : i32
    %c0_i32_1 = arith.constant 0 : i32
    return %c0_i32, %c0_i32_0 : i32, i32
  }
  func.func @transform_7(%arg0: i32) -> (i32, i32) {
    %c0_i32 = arith.constant 0 : i32
    %c0_i32_0 = arith.constant 0 : i32
    %c0_i32_1 = arith.constant 0 : i32
    return %c0_i32, %c0_i32_0 : i32, i32
  }
  func.func @transform_8(%arg0: i32) -> (i32, i32) {
    %c0_i32 = arith.constant 0 : i32
    %c0_i32_0 = arith.constant 0 : i32
    %c0_i32_1 = arith.constant 0 : i32
    return %c0_i32, %c0_i32_0 : i32, i32
  }
  func.func @transform_9(%arg0: i32) -> (i32, i32) {
    %c0_i32 = arith.constant 0 : i32
    %c0_i32_0 = arith.constant 0 : i32
    %c0_i32_1 = arith.constant 0 : i32
    return %c0_i32, %c0_i32_0 : i32, i32
  }
  func.func @transform_10(%arg0: i32) -> (i32, i32) {
    %c0_i32 = arith.constant 0 : i32
    %c0_i32_0 = arith.constant 0 : i32
    %c0_i32_1 = arith.constant 0 : i32
    return %c0_i32, %c0_i32_0 : i32, i32
  }
  func.func @transform_11(%arg0: i32) -> (i32, i32) {
    %c0_i32 = arith.constant 0 : i32
    %c0_i32_0 = arith.constant 0 : i32
    %c0_i32_1 = arith.constant 0 : i32
    return %c0_i32, %c0_i32_0 : i32, i32
  }
  func.func @transform_12(%arg0: i32) -> (i32, i32) {
    %c0_i32 = arith.constant 0 : i32
    %c0_i32_0 = arith.constant 0 : i32
    %c0_i32_1 = arith.constant 0 : i32
    return %c0_i32, %c0_i32_0 : i32, i32
  }
  func.func @transform_13(%arg0: i32) -> (i32, i32) {
    %c0_i32 = arith.constant 0 : i32
    %c0_i32_0 = arith.constant 0 : i32
    %c0_i32_1 = arith.constant 0 : i32
    return %c0_i32, %c0_i32_0 : i32, i32
  }
  func.func @transform_14(%arg0: i32) -> (i32, i32) {
    %c0_i32 = arith.constant 0 : i32
    %c0_i32_0 = arith.constant 0 : i32
    return %arg0, %c0_i32 : i32, i32
  }
}

</mosaic_0001>

<bundles_post_ra>
// kernel: tpu_custom_call.1
= control target key start
LH: loop header
LB: loop body
LE: loop exit
PB: predicated region body
PF: predicated region fallthrough
CT: control target
= control target key end

     0   :  { %v846_v1 = vmov 0.0   ;;  %vm847_vm0 = vmmov 0   ;;  %vm75_vm1 = vcmask 261120   ;;  %s1087_s0 = inlined_call_operand.vmem [shape: bf16[8,32], index: 0, kind: input, shape index: {}]   ;;  %s1088_s1 = inlined_call_operand.vmem [shape: bf16[8,16], index: 1, kind: input, shape index: {}]   ;;  %s1089_s2 = inlined_call_operand.vmem [shape: bf16[32,128], index: 2, kind: input, shape index: {}]   ;;  %s1090_s3 = inlined_call_operand.vmem [shape: f32[1,128], index: 3, kind: input, shape index: {}]   ;;  %s1091_s4 = inlined_call_operand.vmem [shape: bf16[128,64], index: 4, kind: input, shape index: {}]   ;;  %s1092_s5 = inlined_call_operand.vmem [shape: f32[1,64], index: 5, kind: input, shape index: {}]   ;;  %s1093_s6 = inlined_call_operand.vmem [shape: bf16[64,32], index: 6, kind: input, shape index: {}]   ;;  %s1094_s7 = inlined_call_operand.vmem [shape: f32[1,32], index: 7, kind: input, shape index: {}]   ;;  %s1095_s8 = inlined_call_operand.vmem [shape: bf16[16,64], index: 8, kind: input, shape index: {}]   ;;  %s1096_s9 = inlined_call_operand.vmem [shape: f32[1,64], index: 9, kind: input, shape index: {}]   ;;  %s1097_s10 = inlined_call_operand.vmem [shape: bf16[64,128], index: 10, kind: input, shape index: {}]   ;;  %s1098_s11 = inlined_call_operand.vmem [shape: f32[1,128], index: 11, kind: input, shape index: {}]   ;;  %s1099_s12 = inlined_call_operand.vmem [shape: bf16[128,32], index: 12, kind: input, shape index: {}]   ;;  %s1100_s13 = inlined_call_operand.vmem [shape: f32[1,32], index: 13, kind: input, shape index: {}]   ;;  %s1101_s14 = inlined_call_operand.hbm [shape: bf16[8,128], index: 14, kind: output, shape index: {}]  }
   0x1   :  { %v793_v0 = vld [vmem:[%s1089_s2] sm:$0xff]   ;;  %707 = vmatprep.subr.bf16.mxu0 %v846_v1  ;;  %715 = vmatprep.subr.bf16.mxu1 %v846_v1  ;;  %v794_v2 = vld [vmem:[%s1089_s2 + $0x8] sm:$0xff]   ;;  %v797_v6 = vld [vmem:[%s1091_s4 + $0x10] sm:$0xff]  }
   0x2   :  { %708 = vmatpush3.bf16.msra.mxu0 %v793_v0  ;;  %711 = vmatprep.mubr.msk.bf16.mxu0 %vm847_vm0, %v846_v1  ;;  %v795_v3 = vld [vmem:[%s1091_s4] sm:$0xff]   ;;  %v796_v4 = vld [vmem:[%s1091_s4 + $0x8] sm:$0xff]   ;;  %v798_v7 = vld [vmem:[%s1091_s4 + $0x18] sm:$0xff]  }
   0x3   :  { %709 = vmatprep.subr.bf16.mxu0 %v846_v1  ;;  %731 = vmatprep.mubr.msk.bf16.mxu1 %vm847_vm0, %v846_v1  ;;  %v49_v5 = vld [vmem:[%s1087_s0] sm:$0xf]  ;;  %v800_v9 = vld [vmem:[%s1091_s4 + $0x28] sm:$0xff]  }
   0x4   :  { %716 = vmatpush3.bf16.msra.mxu1 %v795_v3  ;;  %v799_v8 = vld [vmem:[%s1091_s4 + $0x20] sm:$0xff]  }
   0x5   :  { %717 = vmatprep.subr.bf16.mxu1 %v846_v1 }
   0x6   :  { %710 = vmatpush3.bf16.msra.mxu0 %v794_v2 }
   0x7   :  { %735 = vmatprep.subr.bf16.mxu0 %v846_v1 }
   0x8   :  { %718 = vmatpush3.bf16.msra.mxu1 %v796_v4 }
   0x9   :  { %712 = vmatmul.mubr.msk.bf16.vlgmr.msra.gmra.mrb[0].mxu0 %vm75_vm1, %v49_v5  ;;  %719 = vmatprep.subr.bf16.mxu1 %v846_v1 }
   0xa   :  { %743 = vmatprep.mubr.msk.bf16.mxu0 %vm847_vm0, %v846_v1 }
   0xc   :  { %720 = vmatpush3.bf16.msra.mxu1 %v797_v6 }
   0xd   :  { %721 = vmatprep.subr.bf16.mxu1 %v846_v1 }
  0x10   :  { %722 = vmatpush3.bf16.msra.mxu1 %v798_v7 }
  0x11   :  { %723 = vmatprep.subr.bf16.mxu1 %v846_v1 }
  0x14   :  { %724 = vmatpush3.bf16.msra.mxu1 %v799_v8 }
  0x15   :  { %725 = vmatprep.subr.bf16.mxu1 %v846_v1 }
  0x16   :  { %19 = vsyncpa [#allocation3], 0  ;;  %v801_v10 = vld [vmem:[%s1091_s4 + $0x30] sm:$0xff]   ;;  %v802_v11 = vld [vmem:[%s1091_s4 + $0x38] sm:$0xff]   ;;  %s848_s0 = smov 16   ;;  %vm277_vm4 = vcmask 523264  }
  0x17   :  { %v803_v12 = vld [vmem:[%s1093_s6] sm:$0xff]   ;;  %v804_v13 = vld [vmem:[%s1093_s6 + $0x8] sm:$0xff]   ;;  %v805_v23 = vld [vmem:[%s1093_s6 + $0x10] sm:$0xff]   ;;  %s849_s29 = smov 112   ;;  %vm350_vm5 = vcmask 130048   ;;  %s851_s17 = smov 48  }
  0x18   :  { %726 = vmatpush3.bf16.msra.mxu1 %v800_v9  ;;  %736 = vmatpush3.bf16.msra.mxu0 %v803_v12  ;;  %v633_v14 = vld [vmem:[%s1090_s3] ss:$0 sm:$0xff]  ;;  %v806_v24 = vld [vmem:[%s1093_s6 + $0x18] sm:$0xff]   ;;  %v809_v52 = vld [vmem:[%s1097_s10 + $0x8] sm:$0xff]   ;;  %vm596_vm8 = vcmask 257024   ;;  %vm604_vm9 = vcmask 388352  }
  0x19   :  { %727 = vmatprep.subr.bf16.mxu1 %v846_v1  ;;  %737 = vmatprep.subr.bf16.mxu0 %v846_v1  ;;  %v50_v25 = vld [vmem:[%s1088_s1] sm:$0xf]  ;;  %v810_v54 = vld [vmem:[%s1097_s10 + $0x10] sm:$0xff]   ;;  %v811_v55 = vld [vmem:[%s1097_s10 + $0x18] sm:$0xff]   ;;  %vm613_vm10 = vcmask 519552   ;;  %vm615_vm11 = vcmask 650752  }
  0x1a   :  { %v51_v26 = vunpack.c.l.bf16 %v50_v25  ;;  %v637_v27 = vld [vmem:[%s1092_s5] ss:$0 sm:$0xff]  ;;  %v813_v57 = vld [vmem:[%s1099_s12 + $0x8] sm:$0xff]   ;;  %v814_v58 = vld [vmem:[%s1099_s12 + $0x10] sm:$0xff]   ;;  %vm617_vm12 = vcmask 1044096  }
  0x1b   :  { %v807_v36 = vld [vmem:[%s1095_s8] sm:$0xff]   ;;  %v815_v59 = vld [vmem:[%s1099_s12 + $0x18] sm:$0xff]   ;;  %v817_v61 = vld [vmem:[%s1099_s12 + $0x28] sm:$0xff]  }
  0x1c   :  { %728 = vmatpush3.bf16.msra.mxu1 %v801_v10  ;;  %738 = vmatpush3.bf16.msra.mxu0 %v804_v13  ;;  %v646_v37 = vld [vmem:[%s1094_s7] ss:$0 sm:$0xff]  ;;  %s850_s7 = smov 32   ;;  %v818_v8 = vld [vmem:[%s1099_s12 + $0x30] sm:$0xff]   ;;  %v819_v9 = vld [vmem:[%s1099_s12 + $0x38] sm:$0xff]  }
  0x1d   :  { %729 = vmatprep.subr.bf16.mxu1 %v846_v1  ;;  %739 = vmatprep.subr.bf16.mxu0 %v846_v1  ;;  %v808_v50 = vld [vmem:[%s1097_s10] sm:$0xff]  }
  0x1e   :  { %325 = vrot.lane.b32.xlu0 %v51_v26, %s848_s0  ;;  %v812_v56 = vld [vmem:[%s1099_s12] sm:$0xff]  }
  0x1f   :  { %v816_v60 = vld [vmem:[%s1099_s12 + $0x20] sm:$0xff]  }
  0x20   :  { %730 = vmatpush3.bf16.msra.mxu1 %v802_v11  ;;  %740 = vmatpush3.bf16.msra.mxu0 %v805_v23  ;;  %v652_v62 = vld [vmem:[%s1096_s9] ss:$0 sm:$0xff] }
  0x21   :  { %765 = vmatprep.subr.bf16.mxu1 %v846_v1  ;;  %741 = vmatprep.subr.bf16.mxu0 %v846_v1  ;;  %v655_v10 = vld [vmem:[%s1098_s11] ss:$0 sm:$0xff]  ;;  %s852_s11 = smov [#allocation2]  }
  0x22   :  { %s625_s12 = sshll.u32 %s852_s11, 4  ;;  %s626_s12 = int_to_ptr.vmem [resolvable:$true] %s625_s12 }
  0x23   :  { %p827_p1 = scmp.lt.s32.totalorder %s626_s12, %s626_s12 }
  0x24   :  { %742 = vmatpush3.bf16.msra.mxu0 %v806_v24 }
  0x25   :  { %747 = vmatprep.subr.bf16.mxu0 %v846_v1 }
  0x90   :  { %v326_v45 = vpop.permute.xlu0 %325 }
  0xdc   :  { %v113_v15 = vpop.f32.mrb[0].mxu0 }
  0xdd   :  { %v114_v16 = vadd.f32 %v633_v14, %v113_v15  ;;  %v713_v17 = vpop.f32.mrb[1].mxu0 }
  0xde   :  { %v116_v18 = vpop.f32.mrb[2].mxu0 }
  0xdf   :  { %vm119_vm2 = vcmp.gt.f32.partialorder %v114_v16, 0.0  ;;  %v120_v19 = vmul.f32 0.01, %v114_v16  ;;  %v714_v20 = vpop.f32.mrb[3].mxu0 }
  0xe1   :  { %v121_v21 = vsel %vm119_vm2, %v114_v16, %v120_v19 }
  0xe2   :  { %v122_v22 = vpack.c.bf16 %v121_v21, %v121_v21 }
  0xe4   :  { %732 = vmatmul.mubr.bf16.vlgmr.msra.gmra.mrb[0].mxu1 %v122_v22 }
  0xe5   :  { %781 = vmatprep.mubr.msk.bf16.mxu1 %vm847_vm0, %v846_v1  ;;  %766 = vmatpush3.bf16.msra.mxu1 %v812_v56 }
  0xe6   :  { %767 = vmatprep.subr.bf16.mxu1 %v846_v1 }
  0xe9   :  { %768 = vmatpush3.bf16.msra.mxu1 %v813_v57 }
  0xea   :  { %769 = vmatprep.subr.bf16.mxu1 %v846_v1 }
  0xed   :  { %770 = vmatpush3.bf16.msra.mxu1 %v814_v58 }
  0xee   :  { %771 = vmatprep.subr.bf16.mxu1 %v846_v1 }
  0xf1   :  { %772 = vmatpush3.bf16.msra.mxu1 %v815_v59 }
  0xf2   :  { %773 = vmatprep.subr.bf16.mxu1 %v846_v1 }
  0xf5   :  { %774 = vmatpush3.bf16.msra.mxu1 %v816_v60 }
  0xf6   :  { %775 = vmatprep.subr.bf16.mxu1 %v846_v1 }
  0xf9   :  { %776 = vmatpush3.bf16.msra.mxu1 %v817_v61 }
  0xfa   :  { %777 = vmatprep.subr.bf16.mxu1 %v846_v1 }
  0xfd   :  { %778 = vmatpush3.bf16.msra.mxu1 %v818_v8 }
  0xfe   :  { %779 = vmatprep.subr.bf16.mxu1 %v846_v1 }
 0x101   :  { %780 = vmatpush3.bf16.msra.mxu1 %v819_v9 }
 0x1b7   :  { %v228_v28 = vpop.f32.mrb[0].mxu1 }
 0x1b8   :  { %v229_v29 = vadd.f32 %v637_v27, %v228_v28  ;;  %v733_v30 = vpop.f32.mrb[1].mxu1  ;;  %v853_v27 = vmov 0  }
 0x1b9   :  { %v231_v31 = vpop.f32.mrb[2].mxu1 }
 0x1ba   :  { %vm234_vm3 = vcmp.gt.f32.partialorder %v229_v29, 0.0  ;;  %v235_v32 = vmul.f32 0.01, %v229_v29  ;;  %v734_v33 = vpop.f32.mrb[3].mxu1 }
 0x1bc   :  { %v236_v34 = vsel %vm234_vm3, %v229_v29, %v235_v32 }
 0x1bd   :  { %v237_v35 = vpack.c.bf16 %v236_v34, %v236_v34 }
 0x1bf   :  { %744 = vmatmul.mubr.msk.bf16.vlgmr.msra.gmra.mrb[4].mxu0 %vm277_vm4, %v237_v35 }
 0x1c0   :  { %749 = vmatprep.mubr.msk.bf16.mxu0 %vm847_vm0, %v846_v1  ;;  %748 = vmatpush3.bf16.msra.mxu0 %v807_v36 }
 0x1c1   :  { %753 = vmatprep.subr.bf16.mxu0 %v846_v1 }
 0x292   :  { %v315_v38 = vpop.f32.mrb[4].mxu0 }
 0x293   :  { %v316_v39 = vadd.f32 %v646_v37, %v315_v38  ;;  %v745_v40 = vpop.f32.mrb[5].mxu0 }
 0x294   :  { %v318_v41 = vpop.f32.mrb[6].mxu0 }
 0x295   :  { %v321_v42 = vmul.f32 0.5, %v316_v39  ;;  %v746_v43 = vpop.f32.mrb[7].mxu0  ;;  %v673_v53 = vpack.c.bf16 %v316_v39, %v316_v39 }
 0x297   :  { %v322_v44 = vmul.f32 1.442695, %v321_v42 }
 0x299   :  { %820 = vpow2.f32 %v322_v44 }
 0x2a3   :  { %v821_v46 = vpop.eup %820 }
 0x2a4   :  { %v328_v47 = vmul.f32 %v821_v46, %v326_v45 }
 0x2a6   :  { %330 = vrot.lane.b32.xlu0 %v328_v47, %s849_s29 }
 0x318   :  { %v331_v48 = vpop.permute.xlu0 %330 }
 0x319   :  { %v333_v49 = vadd.f32 %v331_v48, %v316_v39 }
 0x31b   :  { %v334_v51 = vpack.c.bf16 %v333_v49, %v333_v49 }
 0x31d   :  { %601 = vrot.lane.b32.xlu1 %v334_v51, %s850_s7  ;;  %750 = vmatmul.mubr.msk.bf16.vlgmr.msra.gmra.mrb[8].mxu0 %vm350_vm5, %v334_v51 }
 0x31e   :  { %754 = vmatpush3.bf16.msra.mxu0 %v808_v50  ;;  %761 = vmatprep.mubr.msk.bf16.mxu0 %vm847_vm0, %v846_v1 }
 0x31f   :  { %755 = vmatprep.subr.bf16.mxu0 %v846_v1 }
 0x321   :  { %610 = vrot.lane.b32.xlu1 %v673_v53, %s851_s17 }
 0x322   :  { %756 = vmatpush3.bf16.msra.mxu0 %v809_v52 }
 0x323   :  { %757 = vmatprep.subr.bf16.mxu0 %v846_v1 }
 0x326   :  { %758 = vmatpush3.bf16.msra.mxu0 %v810_v54 }
 0x327   :  { %759 = vmatprep.subr.bf16.mxu0 %v846_v1  ;;  %v661_v1 = vld [vmem:[%s1100_s13] ss:$0 sm:$0xff]  ;;  %s822_s13 = scalar_lea.vmem %s626_s12, 64 }
 0x328   :  { %p823_p0 = scmp.ne.s32.totalorder %s626_s12, %s822_s13  ;;  %p828_p2 = scmp.lt.s32.totalorder %s822_s13, %s822_s13 }
 0x32a   :  { %760 = vmatpush3.bf16.msra.mxu0 %v811_v55  ;;  %p829_p3 = por %p828_p2, %p827_p1 }
 0x32c   :  { %p830_p4 = pnand %p829_p3, %p823_p0 }
 0x38f   :  { %v602_v19 = vpop.permute.xlu1 %601 }
 0x393   :  { %v611_v26 = vpop.permute.xlu1 %610 }
 0x3f0   :  { %v388_v63 = vpop.f32.mrb[8].mxu0 }
 0x3f1   :  { %v389_v0 = vadd.f32 %v652_v62, %v388_v63  ;;  %v751_v2 = vpop.f32.mrb[9].mxu0 }
 0x3f2   :  { %v391_v3 = vpop.f32.mrb[10].mxu0 }
 0x3f3   :  { %vm394_vm6 = vcmp.gt.f32.partialorder %v389_v0, 0.0  ;;  %v395_v4 = vmul.f32 0.01, %v389_v0  ;;  %v752_v5 = vpop.f32.mrb[11].mxu0 }
 0x3f5   :  { %v396_v6 = vsel %vm394_vm6, %v389_v0, %v395_v4 }
 0x3f6   :  { %v397_v7 = vpack.c.bf16 %v396_v6, %v396_v6 }
 0x3f8   :  { %762 = vmatmul.mubr.msk.bf16.vlgmr.msra.gmra.mrb[12].mxu0 %vm277_vm4, %v397_v7 }
 0x4cb   :  { %v474_v11 = vpop.f32.mrb[12].mxu0 }
 0x4cc   :  { %v475_v12 = vadd.f32 %v655_v10, %v474_v11  ;;  %v763_v13 = vpop.f32.mrb[13].mxu0 }
 0x4cd   :  { %v477_v14 = vpop.f32.mrb[14].mxu0 }
 0x4ce   :  { %vm480_vm7 = vcmp.gt.f32.partialorder %v475_v12, 0.0  ;;  %v481_v15 = vmul.f32 0.01, %v475_v12  ;;  %v764_v16 = vpop.f32.mrb[15].mxu0 }
 0x4d0   :  { %v482_v17 = vsel %vm480_vm7, %v475_v12, %v481_v15 }
 0x4d1   :  { %v483_v18 = vpack.c.bf16 %v482_v17, %v482_v17 }
 0x4d3   :  { %782 = vmatmul.mubr.bf16.vlgmr.msra.gmra.mrb[4].mxu1 %v483_v18 }
 0x5a6   :  { %v589_v20 = vpop.f32.mrb[4].mxu1 }
 0x5a7   :  { %v590_v21 = vadd.f32 %v661_v1, %v589_v20  ;;  %v783_v22 = vpop.f32.mrb[5].mxu1 }
 0x5a8   :  { %v592_v23 = vpop.f32.mrb[6].mxu1 }
 0x5a9   :  { %v595_v24 = vpack.c.bf16 %v590_v21, %v590_v21  ;;  %v784_v25 = vpop.f32.mrb[7].mxu1 }
 0x5ab   :  { %597 = vst.msk [vmem:[#allocation2] sm:$0xf] %vm596_vm8, %v595_v24 }
 0x5ac   :  { %605 = vst.msk [vmem:[#allocation2] sm:$0xf] %vm604_vm9, %v602_v19 }
 0x5ad   :  { %614 = vst.msk [vmem:[#allocation2] sm:$0xf] %vm613_vm10, %v611_v26 }
 0x5ae   :  { %616 = vst.msk [vmem:[#allocation2] sm:$0xf] %vm615_vm11, %v611_v26 }
 0x5af   :  { %618 = vst.msk [vmem:[#allocation2] sm:$0xf] %vm617_vm12, %v853_v27 }
 0x5b0   :  { %833 = shalt.err (!%p830_p4)
}
 0x5b1   :  { %s834_s19 = scalar_lea.hbm %s1101_s14, 64 }
 0x5b2   :  { %p835_p5 = scmp.ne.s32.totalorder %s1101_s14, %s834_s19  ;;  %p838_p6 = scmp.lt.u32.totalorder %s834_s19, %s1101_s14 }
 0x5b4   :  { %p840_p7 = pnand %p838_p6, %p835_p5 }
 0x5b6   :  { %843 = shalt.err (!%p840_p7)
}
 0x5b7   :  { %628 = dma.vmem_to_hbm [thread:$0]  %s626_s12, 64, %s1101_s14, [#allocation3]  }
 0x5b8   :  { %844 = dma.done.wait [#allocation3], 64  }
 0x5b9   :  { %845 = vsyncadd [#allocation3], 4294967232 }
 0x5ba   :  { %632 = vsyncpa [#allocation3], 1 }

</bundles_post_ra>
